<compile_context>
chip_gen: v7x
topology: tpu7x:2x2x1
jax: 0.10.0
libtpu: 0.0.40
codegen_flags: <defaults>
</compile_context>

<pallas_src>
import jax
import jax.numpy as jnp
from jax.experimental import pallas as pl
from jax.experimental.pallas import tpu as pltpu


_TARGET_BLOCK_BYTES = 4 * 1024 * 1024      # per pipelined buffer (~4 MiB)
_MIN_PARALLEL_BLOCK_BYTES = 256 * 1024     # don't split below this per block
_VMEM_LIMIT_BYTES = 32 * 1024 * 1024       # 2 in + 2 out x 4 MiB = 16 MiB + headroom


def _relu_kernel(x_ref, o_ref):
    # Pure VPU elementwise max against a scalar zero (no zero tile materialized).
    o_ref[...] = jnp.maximum(x_ref[...], 0)


def _relu_tiny(x_flat):
    """Whole-array (<128 elements) ReLU as a single full-extent Pallas block."""
    n = x_flat.shape[0]
    out2d = pl.pallas_call(
        _relu_kernel,
        out_shape=jax.ShapeDtypeStruct((1, n), x_flat.dtype),
    )(x_flat.reshape(1, n))
    return out2d.reshape(n)


def _relu_2d(x2d, *, tile_rows, lanes, donate):
    rows = x2d.shape[0]
    itemsize = x2d.dtype.itemsize
    grid = (pl.cdiv(rows, tile_rows),)
    extra = {"input_output_aliases": {0: 0}} if donate else {}
    return pl.pallas_call(
        _relu_kernel,
        out_shape=jax.ShapeDtypeStruct((rows, lanes), x2d.dtype),
        grid=grid,
        in_specs=[pl.BlockSpec((tile_rows, lanes), lambda i: (i, 0))],
        out_specs=pl.BlockSpec((tile_rows, lanes), lambda i: (i, 0)),
        compiler_params=pltpu.CompilerParams(
            dimension_semantics=("parallel",),
            vmem_limit_bytes=_VMEM_LIMIT_BYTES,
        ),
        cost_estimate=pl.CostEstimate(
            flops=rows * lanes,
            transcendentals=0,
            bytes_accessed=2 * rows * lanes * itemsize,
        ),
        **extra,
    )(x2d)


def relu_pallas(x: jax.Array, donate: bool = False) -> jax.Array:
    """ReLU implemented as a Pallas TPU kernel. Accepts any shape / dtype."""
    orig_shape = x.shape
    dtype = x.dtype
    n = x.size
    if n == 0:
        return x

    itemsize = jnp.dtype(dtype).itemsize
    # Sublane packing: f32 -> 8, bf16/f16 -> 16, int8/fp8 -> 32.
    sublane = {4: 8, 2: 16, 1: 32}.get(itemsize, 8)

    x_flat = x.reshape(-1)
    n_main = (n // 128) * 128
    tail = n - n_main

    if n_main == 0:
        # Entire array is smaller than one lane row.
        return _relu_tiny(x_flat).reshape(orig_shape)

    # Lane-dense 2D slab: largest divisor of (n_main/128) up to 32 -> lanes in
    # [128, 4096]; always divides exactly, so no pad copy is ever needed.
    m = n_main // 128
    lanes_mult = 1
    for cand in range(32, 0, -1):
        if m % cand == 0:
            lanes_mult = cand
            break
    lanes = 128 * lanes_mult
    rows = n_main // lanes
    row_bytes = lanes * itemsize

    # ~4 MiB per buffer target.
    tile_rows = max(1, _TARGET_BLOCK_BYTES // row_bytes)
    # Keep >= 4 grid steps on big-enough slabs so v7x's 2 TensorCores each get
    # at least 2 blocks (on v5e/v6e this is a no-op for correctness/perf).
    if n_main * itemsize >= 4 * _MIN_PARALLEL_BLOCK_BYTES:
        tile_rows = min(tile_rows, pl.cdiv(rows, 4))
    # Sublane-align; if everything fits in one block use the exact row extent
    # (a full-extent block shape is always legal -> no partial-block masking
    # for the rows < sublane case).
    tile_rows = max((tile_rows // sublane) * sublane, sublane)
    if tile_rows >= rows:
        tile_rows = rows

    x_main = x_flat if tail == 0 else x_flat[:n_main]
    main_out = _relu_2d(
        x_main.reshape(rows, lanes), tile_rows=tile_rows, lanes=lanes, donate=donate
    ).reshape(n_main)

    if tail == 0:
        return main_out.reshape(orig_shape)

    # Ragged tail (< 128 elements): plain fused elementwise max. Avoids the old
    # jnp.pad + out[:n] pair that cost two extra full HBM passes.
    tail_out = jnp.maximum(x_flat[n_main:], 0)
    return jnp.concatenate([main_out, tail_out]).reshape(orig_shape)


class Model:
    """JAX equivalent of the PyTorch Model: forward(input) = ReLU(input).

    (nn.Sigmoid is constructed in the original module but unused in forward.)
    """

    def __init__(self):
        self._relu = jax.jit(relu_pallas)  # nn.ReLU has no parameters

    def __call__(self, x):
        return self._relu(x)


if __name__ == "__main__":
    key = jax.random.PRNGKey(0)
    model = Model()

    # Main NCHW input consistent with a typical image batch: (2, 4, 16, 16).
    x = jax.random.normal(key, (2, 4, 16, 16), dtype=jnp.float32)
    out = jax.block_until_ready(model(x))
    ref = jnp.maximum(x, 0.0)
    assert out.shape == x.shape and out.dtype == x.dtype
    assert jnp.allclose(out, ref), "mismatch vs reference ReLU (f32, divisible)"

    # Tiny ragged size (< 128 elements) exercises the full-extent tiny block path.
    k1, k2, k3 = jax.random.split(key, 3)
    x2 = jax.random.normal(k1, (3, 5, 7), dtype=jnp.float32)
    out2 = jax.block_until_ready(model(x2))
    assert jnp.allclose(out2, jnp.maximum(x2, 0.0)), "mismatch (tiny ragged f32)"

    # Ragged size >= 128 exercises the prefix-kernel + fused-tail path.
    x4 = jax.random.normal(k3, (5, 7, 11), dtype=jnp.float32)  # 385 = 3*128 + 1
    out4 = jax.block_until_ready(model(x4))
    assert jnp.allclose(out4, jnp.maximum(x4, 0.0)), "mismatch (ragged prefix+tail)"

    # bf16 exercises the dtype-aware (16-row sublane) block path.
    x3 = jax.random.normal(k2, (2, 4, 16, 16), dtype=jnp.bfloat16)
    out3 = jax.block_until_ready(model(x3))
    assert out3.dtype == jnp.bfloat16
    assert jnp.allclose(
        out3.astype(jnp.float32), jnp.maximum(x3, 0).astype(jnp.float32)
    ), "mismatch (bf16)"

    print("KERNEL_OK")
</pallas_src>

<mosaic_0001>
module attributes {stable_mosaic.version = 11 : i64} {
  func.func @_relu_kernel(%arg0: i32, %arg1: memref<1x2048xf32, #tpu.memory_space<vmem>>, %arg2: memref<1x2048xf32, #tpu.memory_space<vmem>>) attributes {dimension_semantics = [#tpu.dimension_semantics<parallel>], iteration_bounds = array<i64: 1>, scalar_prefetch = 0 : i64, scratch_operands = 0 : i64, tpu.core_type = #tpu.core_type<tc>, window_params = [{transform_indices = @transform_0, window_bounds = array<i64: 1, 2048>}, {transform_indices = @transform_1, window_bounds = array<i64: 1, 2048>}]} {
    %c0 = arith.constant 0 : index
    %c0_0 = arith.constant 0 : index
    %0 = vector.load %arg1[%c0, %c0_0] : memref<1x2048xf32, #tpu.memory_space<vmem>>, vector<1x2048xf32>
    %cst = arith.constant 0.000000e+00 : f32
    %1 = vector.broadcast %cst : f32 to vector<1x2048xf32>
    %2 = arith.maximumf %0, %1 : vector<1x2048xf32>
    %c0_1 = arith.constant 0 : index
    %c0_2 = arith.constant 0 : index
    %3 = vector.load %arg2[%c0_1, %c0_2] : memref<1x2048xf32, #tpu.memory_space<vmem>>, vector<1x2048xf32>
    tpu.vector_store %arg2[%c0_1, %c0_2], %2 {strides = array<i32>} : memref<1x2048xf32, #tpu.memory_space<vmem>>, vector<1x2048xf32>,
    return
  }
  func.func @transform_0(%arg0: i32) -> (i32, i32) {
    %c0_i32 = arith.constant 0 : i32
    %c0_i32_0 = arith.constant 0 : i32
    return %arg0, %c0_i32 : i32, i32
  }
  func.func @transform_1(%arg0: i32) -> (i32, i32) {
    %c0_i32 = arith.constant 0 : i32
    %c0_i32_0 = arith.constant 0 : i32
    return %arg0, %c0_i32 : i32, i32
  }
}

</mosaic_0001>

<bundles_post_ra>
// kernel: relu_pallas.1
= control target key start
LH: loop header
LB: loop body
LE: loop exit
PB: predicated region body
PF: predicated region fallthrough
CT: control target
= control target key end

     0   :  { %s40_s0 = inlined_call_operand.vmem [shape: f32[1,2048], index: 0, kind: input, shape index: {}]   ;;  %s41_s1 = inlined_call_operand.vmem [shape: f32[1,2048], index: 1, kind: output, shape index: {}]  }
   0x1   :  { %v8_v0 = vld [vmem:[%s40_s0] sm:$0xff]  ;;  %v9_v1 = vld [vmem:[%s40_s0 + $0x8] sm:$0xff] }
   0x2   :  { %v10_v2 = vmax.f32 %v8_v0, 0.0  ;;  %v11_v3 = vmax.f32 %v9_v1, 0.0 }
   0x4   :  { %12 = vst [vmem:[%s41_s1] sm:$0xff] %v10_v2  ;;  %13 = vst [vmem:[%s41_s1 + $0x8] sm:$0xff] %v11_v3 }

</bundles_post_ra>
